<compile_context>
chip_gen: v7x
topology: tpu7x:2x2x1
jax: 0.10.0
libtpu: 0.0.40
codegen_flags: <defaults>
</compile_context>

<pallas_src>
import functools
import math

import jax
import jax.numpy as jnp
from jax.experimental import pallas as pl
from jax.experimental.pallas import tpu as pltpu

_LANE = 128
_SUBLANE = 8


def _round_up(x, m):
    return (x + m - 1) // m * m


def _cdiv(a, b):
    return -(-a // b)


def _gelu(h, approx):
    if approx:
        # tanh-approx GELU: jnp.tanh lowers to the EUP (separate bundle slot),
        # relieving the VALU for small feature dims. Slightly different
        # numerics from torch.nn.GELU() default, so off by default.
        c = jnp.float32(math.sqrt(2.0 / math.pi))
        return 0.5 * h * (1.0 + jnp.tanh(c * (h + jnp.float32(0.044715) * h * h * h)))
    # Exact erf-form GELU (matches torch.nn.GELU() default).
    return 0.5 * h * (1.0 + jax.lax.erf(h * jnp.float32(1.0 / math.sqrt(2.0))))


def _mlp_kernel_resident(x_ref, w1_ref, b1_ref, w2_ref, b2_ref, o_ref, *, approx):
    """Weights fully resident in VMEM; 1-D grid over token tiles."""
    h = jnp.dot(x_ref[...], w1_ref[...], preferred_element_type=jnp.float32)
    h = h + b1_ref[...].astype(jnp.float32)
    h = _gelu(h, approx)
    # dropout (eval mode) -> identity.
    y = jnp.dot(h.astype(w2_ref.dtype), w2_ref[...],
                preferred_element_type=jnp.float32)
    y = y + b2_ref[...].astype(jnp.float32)
    # dropout (eval mode) -> identity.
    o_ref[...] = y.astype(o_ref.dtype)


def _mlp_kernel_chunked(x_ref, w1_ref, b1_ref, w2_ref, b2_ref, o_ref, acc_ref,
                        *, approx):
    """Hidden dim streamed in chunks (grid axis 1) with an f32 accumulator."""
    k = pl.program_id(1)

    @pl.when(k == 0)
    def _init():
        acc_ref[...] = jnp.zeros_like(acc_ref)

    h = jnp.dot(x_ref[...], w1_ref[...], preferred_element_type=jnp.float32)
    h = h + b1_ref[...].astype(jnp.float32)
    h = _gelu(h, approx)
    # dropout (eval mode) -> identity.
    acc_ref[...] += jnp.dot(h.astype(w2_ref.dtype), w2_ref[...],
                            preferred_element_type=jnp.float32)

    @pl.when(k == pl.num_programs(1) - 1)
    def _finalize():
        y = acc_ref[...] + b2_ref[...].astype(jnp.float32)
        # dropout (eval mode) -> identity.
        o_ref[...] = y.astype(o_ref.dtype)


def _vmem_budget():
    """Per-generation scoped-VMEM limit and kernel footprint target (bytes)."""
    cap = 64 * 1024 * 1024  # conservative default: v7x per-TensorCore VMEM
    try:
        info = pltpu.get_tpu_info()
        cap = int(getattr(info, "vmem_capacity_bytes", cap)) or cap
    except Exception:  # hardware query unavailable; never wraps the kernel call
        pass
    limit = int(cap * 0.75)      # v5e/v6e -> ~96 MiB scoped, v7x -> ~48 MiB
    target = int(limit * 0.85)   # explicit headroom for compiler-internal scratch
    return limit, target


def _pad2d(a, rows, cols):
    r, c = a.shape
    if r == rows and c == cols:
        return a
    return jnp.zeros((rows, cols), a.dtype).at[:r, :c].set(a)


def mlp_pallas(x, w1, b1, w2, b2, *, tile_tokens=None, tile_hidden=None,
               compute_dtype=jnp.bfloat16, approx_gelu=False):
    """x: (N, Din); w1: (Din, H); b1: (H,); w2: (H, Dout); b2: (Dout,)."""
    N, Din = x.shape
    Din_w, H = w1.shape
    H_w, Dout = w2.shape
    assert Din == Din_w and H == H_w and b1.shape == (H,) and b2.shape == (Dout,)

    out_dtype = x.dtype
    if compute_dtype is not None:
        if x.dtype != compute_dtype:
            x = x.astype(compute_dtype)
        w1 = w1.astype(compute_dtype)
        w2 = w2.astype(compute_dtype)

    isz = jnp.dtype(x.dtype).itemsize
    wsz = jnp.dtype(w1.dtype).itemsize
    osz = jnp.dtype(out_dtype).itemsize

    vmem_limit, vmem_target = _vmem_budget()

    # ---- token tiling: sublane-multiple, >= 2 tiles so both v7x TensorCores
    #      get work; large enough to amortize per-step overhead.
    tn = tile_tokens or (1024 if isz <= 2 else 512)
    if N > _SUBLANE:
        tn = min(tn, _round_up(_cdiv(N, 2), _SUBLANE))
    tn = max(_SUBLANE, _round_up(min(tn, _round_up(N, _SUBLANE)), _SUBLANE))

    # ---- VMEM footprint models (double-buffered activations; resident or
    #      double-buffered weight chunks; f32 intermediates; sublane-padded
    #      bias blocks).
    def fp_resident(tn_):
        return (2 * tn_ * Din * isz                  # x tile (2 buffers)
                + 2 * tn_ * Dout * osz               # out tile (2 buffers)
                + (Din * H + H * Dout) * wsz         # W1/W2 resident (1 buffer)
                + 8 * (H + Dout) * 4                 # biases
                + tn_ * H * (4 + wsz)                # fc1 f32 + operand cast
                + tn_ * Dout * 4)                    # f32 fc2 result

    def fp_chunked(tn_, th_):
        return (2 * tn_ * Din * isz
                + 2 * tn_ * Dout * osz
                + 2 * (Din * th_ + th_ * Dout) * wsz  # W1/W2 chunks (2 buffers)
                + 2 * 8 * th_ * 4 + 8 * Dout * 4      # biases
                + tn_ * th_ * (4 + wsz)               # fc1 f32 + operand cast
                + tn_ * Dout * 4)                     # f32 accumulator

    lane_mult = 256 if H >= 256 else _LANE            # v6e/v7x MXU is 256x256
    force_chunk = (tile_hidden is not None
                   and _round_up(tile_hidden, lane_mult) < _round_up(H, lane_mult))

    mode = None
    if not force_chunk:
        t = tn
        while t > _SUBLANE and fp_resident(t) > vmem_target:
            t = max(_SUBLANE, _round_up(t // 2, _SUBLANE))
        if fp_resident(t) <= vmem_target:
            mode, tn = "resident", t

    th = None
    if mode is None:
        th = _round_up(min(tile_hidden or 2048, H), lane_mult)
        while th > lane_mult and fp_chunked(min(tn, 256), th) > vmem_target:
            th = max(lane_mult, _round_up(th // 2, lane_mult))
        while tn > _SUBLANE and fp_chunked(tn, th) > vmem_target:
            tn = max(_SUBLANE, _round_up(tn // 2, _SUBLANE))
        mode = "chunked"

    n_tok = _cdiv(N, tn)
    approx = bool(approx_gelu)
    b1_2d = b1.reshape(1, H).astype(jnp.float32)
    b2_2d = b2.reshape(1, Dout).astype(jnp.float32)

    if mode == "resident":
        grid = (n_tok,)
        kernel = functools.partial(_mlp_kernel_resident, approx=approx)
        # Constant-over-the-grid blocks -> single VMEM buffer, loaded once.
        single = functools.partial(pl.BlockSpec, pipeline_mode=pl.Buffered(1))
        in_specs = [
            pl.BlockSpec((tn, Din), lambda i: (i, 0)),
            single((Din, H), lambda i: (0, 0)),
            single((1, H), lambda i: (0, 0)),
            single((H, Dout), lambda i: (0, 0)),
            single((1, Dout), lambda i: (0, 0)),
        ]
        out_specs = pl.BlockSpec((tn, Dout), lambda i: (i, 0))
        scratch = []
        dims = ("parallel",)
        w_stream_factor = 1
        args = (x, w1, b1_2d, w2, b2_2d)
    else:
        n_h = _cdiv(H, th)
        H_pad = n_h * th
        # Zero-padding H is numerically exact (GELU(0)=0, zero rows of W2
        # contribute nothing) and only touches the jit-cacheable weights.
        w1 = _pad2d(w1, Din, H_pad)
        w2 = _pad2d(w2, H_pad, Dout)
        b1_2d = _pad2d(b1_2d, 1, H_pad)
        grid = (n_tok, n_h)
        kernel = functools.partial(_mlp_kernel_chunked, approx=approx)
        in_specs = [
            pl.BlockSpec((tn, Din), lambda i, k: (i, 0)),
            pl.BlockSpec((Din, th), lambda i, k: (0, k)),
            pl.BlockSpec((1, th), lambda i, k: (0, k)),
            pl.BlockSpec((th, Dout), lambda i, k: (k, 0)),
            pl.BlockSpec((1, Dout), lambda i, k: (0, 0),
                         pipeline_mode=pl.Buffered(1)),
        ]
        out_specs = pl.BlockSpec((tn, Dout), lambda i, k: (i, 0))
        scratch = [pltpu.VMEM((tn, Dout), jnp.float32)]
        dims = ("parallel", "arbitrary")
        w_stream_factor = n_tok           # weight chunks re-streamed per token tile
        args = (x, w1, b1_2d, w2, b2_2d)

    cost = pl.CostEstimate(
        flops=int(2 * N * (Din * H + H * Dout)),
        transcendentals=int(N * H) if approx else 0,   # erf lowers to VPU poly
        bytes_accessed=int(N * Din * isz + N * Dout * osz
                           + w_stream_factor * (Din * H + H * Dout) * wsz
                           + (H + Dout) * 4),
    )

    out = pl.pallas_call(
        kernel,
        out_shape=jax.ShapeDtypeStruct((N, Dout), out_dtype),
        grid_spec=pltpu.PrefetchScalarGridSpec(
            num_scalar_prefetch=0,
            grid=grid,
            in_specs=in_specs,
            out_specs=out_specs,
            scratch_shapes=scratch,
        ),
        compiler_params=pltpu.CompilerParams(
            dimension_semantics=dims,
            vmem_limit_bytes=vmem_limit,
        ),
        cost_estimate=cost,
    )(*args)
    return out


def mlp_reference(x, w1, b1, w2, b2):
    h = x @ w1 + b1
    h = 0.5 * h * (1.0 + jax.lax.erf(h / jnp.sqrt(jnp.float32(2.0))))
    return h @ w2 + b2


if __name__ == "__main__":
    # Shapes implied by the module: batch=2, seq=8, in_feature=32,
    # hidden=32 (default hidde_feature=in_feature), out=32 (default).
    batch, seq = 2, 8
    in_feature, hidden, out_feature = 32, 32, 32

    key = jax.random.PRNGKey(0)
    kx, kw1, kb1, kw2, kb2 = jax.random.split(key, 5)

    x = jax.random.normal(kx, (batch, seq, in_feature), dtype=jnp.float32)

    # Deterministic parameter init (PyTorch nn.Linear-style uniform ranges),
    # weights pre-transposed to (in, out).
    lim1 = 1.0 / math.sqrt(in_feature)
    lim2 = 1.0 / math.sqrt(hidden)
    w1 = jax.random.uniform(kw1, (in_feature, hidden), jnp.float32, -lim1, lim1)
    b1 = jax.random.uniform(kb1, (hidden,), jnp.float32, -lim1, lim1)
    w2 = jax.random.uniform(kw2, (hidden, out_feature), jnp.float32, -lim2, lim2)
    b2 = jax.random.uniform(kb2, (out_feature,), jnp.float32, -lim2, lim2)

    x_flat = x.reshape(batch * seq, in_feature)
    ref = mlp_reference(x_flat, w1, b1, w2, b2)

    # f32-operand path (resident-weight kernel, no padding/copies): exact check.
    out_f32 = mlp_pallas(x_flat, w1, b1, w2, b2, compute_dtype=jnp.float32)
    jax.block_until_ready(out_f32)
    assert out_f32.shape == (batch * seq, out_feature)
    assert jnp.allclose(out_f32, ref, atol=1e-5, rtol=1e-5), "f32 mismatch vs reference"

    # Default bf16-operand MXU path (f32 accumulation): loose-tolerance check.
    out_bf16 = mlp_pallas(x_flat, w1, b1, w2, b2)
    jax.block_until_ready(out_bf16)
    assert out_bf16.shape == (batch * seq, out_feature)
    assert jnp.allclose(out_bf16, ref, atol=1e-1, rtol=1e-1), "bf16 mismatch vs reference"

    # Exercise the hidden-chunked fallback path (accumulator kernel) once.
    kc = jax.random.split(key, 10)
    Din2, H2, Dout2, N2 = 256, 1024, 256, 64
    xc = jax.random.normal(kc[5], (N2, Din2), jnp.float32)
    w1c = jax.random.uniform(kc[6], (Din2, H2), jnp.float32, -0.05, 0.05)
    b1c = jax.random.uniform(kc[7], (H2,), jnp.float32, -0.05, 0.05)
    w2c = jax.random.uniform(kc[8], (H2, Dout2), jnp.float32, -0.05, 0.05)
    b2c = jax.random.uniform(kc[9], (Dout2,), jnp.float32, -0.05, 0.05)
    ref_c = mlp_reference(xc, w1c, b1c, w2c, b2c)
    out_c = mlp_pallas(xc, w1c, b1c, w2c, b2c,
                       compute_dtype=jnp.float32, tile_hidden=256)
    jax.block_until_ready(out_c)
    assert out_c.shape == (N2, Dout2)
    assert jnp.allclose(out_c, ref_c, atol=1e-4, rtol=1e-4), "chunked mismatch vs reference"

    out = out_f32.reshape(batch, seq, out_feature)
    print("KERNEL_OK")
</pallas_src>

<mosaic_0001>
module attributes {stable_mosaic.version = 11 : i64} {
  func.func @_mlp_kernel_resident(%arg0: i32, %arg1: memref<8x32xf32, #tpu.memory_space<vmem>>, %arg2: memref<32x32xf32, #tpu.memory_space<vmem>>, %arg3: memref<1x32xf32, #tpu.memory_space<vmem>>, %arg4: memref<32x32xf32, #tpu.memory_space<vmem>>, %arg5: memref<1x32xf32, #tpu.memory_space<vmem>>, %arg6: memref<8x32xf32, #tpu.memory_space<vmem>>) attributes {dimension_semantics = [#tpu.dimension_semantics<parallel>], iteration_bounds = array<i64: 2>, scalar_prefetch = 0 : i64, scratch_operands = 0 : i64, tpu.core_type = #tpu.core_type<tc>, window_params = [{transform_indices = @transform_0, window_bounds = array<i64: 8, 32>}, {pipeline_mode = #tpu.pipeline_mode<synchronous>, transform_indices = @transform_1, window_bounds = array<i64: 32, 32>}, {pipeline_mode = #tpu.pipeline_mode<synchronous>, transform_indices = @transform_2, window_bounds = array<i64: 1, 32>}, {pipeline_mode = #tpu.pipeline_mode<synchronous>, transform_indices = @transform_3, window_bounds = array<i64: 32, 32>}, {pipeline_mode = #tpu.pipeline_mode<synchronous>, transform_indices = @transform_4, window_bounds = array<i64: 1, 32>}, {transform_indices = @transform_5, window_bounds = array<i64: 8, 32>}]} {
    %c0 = arith.constant 0 : index
    %c0_0 = arith.constant 0 : index
    %0 = vector.load %arg1[%c0, %c0_0] : memref<8x32xf32, #tpu.memory_space<vmem>>, vector<8x32xf32>
    %c0_1 = arith.constant 0 : index
    %c0_2 = arith.constant 0 : index
    %1 = vector.load %arg2[%c0_1, %c0_2] : memref<32x32xf32, #tpu.memory_space<vmem>>, vector<32x32xf32>
    %cst = arith.constant dense<0.000000e+00> : vector<8x32xf32>
    %2 = tpu.matmul %0, %1, %cst {dimension_numbers = #tpu.dot_dimension_numbers<[1], [0], [0], [1], [0, 0, 1, 1], [], []>} : vector<8x32xf32>, vector<32x32xf32>, vector<8x32xf32> -> vector<8x32xf32>
    %c0_3 = arith.constant 0 : index
    %c0_4 = arith.constant 0 : index
    %3 = vector.load %arg3[%c0_3, %c0_4] : memref<1x32xf32, #tpu.memory_space<vmem>>, vector<1x32xf32>
    %4 = vector.broadcast %3 : vector<1x32xf32> to vector<8x32xf32>
    %5 = arith.addf %2, %4 : vector<8x32xf32>
    %cst_5 = arith.constant 5.000000e-01 : f32
    %6 = vector.broadcast %cst_5 : f32 to vector<8x32xf32>
    %7 = arith.mulf %6, %5 : vector<8x32xf32>
    %cst_6 = arith.constant 0.707106769 : f32
    %8 = vector.broadcast %cst_6 : f32 to vector<8x32xf32>
    %9 = arith.mulf %5, %8 : vector<8x32xf32>
    %10 = math.erf %9 : vector<8x32xf32>
    %cst_7 = arith.constant 1.000000e+00 : f32
    %11 = vector.broadcast %cst_7 : f32 to vector<8x32xf32>
    %12 = arith.addf %11, %10 : vector<8x32xf32>
    %13 = arith.mulf %7, %12 : vector<8x32xf32>
    %c0_8 = arith.constant 0 : index
    %c0_9 = arith.constant 0 : index
    %14 = vector.load %arg4[%c0_8, %c0_9] : memref<32x32xf32, #tpu.memory_space<vmem>>, vector<32x32xf32>
    %cst_10 = arith.constant dense<0.000000e+00> : vector<8x32xf32>
    %15 = tpu.matmul %13, %14, %cst_10 {dimension_numbers = #tpu.dot_dimension_numbers<[1], [0], [0], [1], [0, 0, 1, 1], [], []>} : vector<8x32xf32>, vector<32x32xf32>, vector<8x32xf32> -> vector<8x32xf32>
    %c0_11 = arith.constant 0 : index
    %c0_12 = arith.constant 0 : index
    %16 = vector.load %arg5[%c0_11, %c0_12] : memref<1x32xf32, #tpu.memory_space<vmem>>, vector<1x32xf32>
    %17 = vector.broadcast %16 : vector<1x32xf32> to vector<8x32xf32>
    %18 = arith.addf %15, %17 : vector<8x32xf32>
    %c0_13 = arith.constant 0 : index
    %c0_14 = arith.constant 0 : index
    %19 = vector.load %arg6[%c0_13, %c0_14] : memref<8x32xf32, #tpu.memory_space<vmem>>, vector<8x32xf32>
    tpu.vector_store %arg6[%c0_13, %c0_14], %18 {strides = array<i32>} : memref<8x32xf32, #tpu.memory_space<vmem>>, vector<8x32xf32>,
    return
  }
  func.func @transform_0(%arg0: i32) -> (i32, i32) {
    %c0_i32 = arith.constant 0 : i32
    %c0_i32_0 = arith.constant 0 : i32
    return %arg0, %c0_i32 : i32, i32
  }
  func.func @transform_1(%arg0: i32) -> (i32, i32) {
    %c0_i32 = arith.constant 0 : i32
    %c0_i32_0 = arith.constant 0 : i32
    %c0_i32_1 = arith.constant 0 : i32
    return %c0_i32, %c0_i32_0 : i32, i32
  }
  func.func @transform_2(%arg0: i32) -> (i32, i32) {
    %c0_i32 = arith.constant 0 : i32
    %c0_i32_0 = arith.constant 0 : i32
    %c0_i32_1 = arith.constant 0 : i32
    return %c0_i32, %c0_i32_0 : i32, i32
  }
  func.func @transform_3(%arg0: i32) -> (i32, i32) {
    %c0_i32 = arith.constant 0 : i32
    %c0_i32_0 = arith.constant 0 : i32
    %c0_i32_1 = arith.constant 0 : i32
    return %c0_i32, %c0_i32_0 : i32, i32
  }
  func.func @transform_4(%arg0: i32) -> (i32, i32) {
    %c0_i32 = arith.constant 0 : i32
    %c0_i32_0 = arith.constant 0 : i32
    %c0_i32_1 = arith.constant 0 : i32
    return %c0_i32, %c0_i32_0 : i32, i32
  }
  func.func @transform_5(%arg0: i32) -> (i32, i32) {
    %c0_i32 = arith.constant 0 : i32
    %c0_i32_0 = arith.constant 0 : i32
    return %arg0, %c0_i32 : i32, i32
  }
}

</mosaic_0001>

<bundles_post_ra>
// kernel: tpu_custom_call.1
= control target key start
LH: loop header
LB: loop body
LE: loop exit
PB: predicated region body
PF: predicated region fallthrough
CT: control target
= control target key end

     0   :  { %10 = vsyncpa [#allocation3], 0  ;;  %s1125_s0 = inlined_call_operand.hbm [shape: f32[16,32], index: 0, kind: input, shape index: {}]   ;;  %s1126_s1 = inlined_call_operand.hbm [shape: f32[32,32], index: 1, kind: input, shape index: {}]   ;;  %s1127_s2 = inlined_call_operand.vmem [shape: f32[1,32], index: 2, kind: input, shape index: {}]   ;;  %s1128_s3 = inlined_call_operand.hbm [shape: f32[32,32], index: 3, kind: input, shape index: {}]   ;;  %s1129_s4 = inlined_call_operand.vmem [shape: f32[1,32], index: 4, kind: input, shape index: {}]   ;;  %s1130_s5 = inlined_call_operand.hbm [shape: f32[16,32], index: 5, kind: output, shape index: {}]  }
   0x1   :  { %12 = vsyncpa [#allocation3 + $0x1], 0 }
   0x2   :  { %13 = vsyncpa [#allocation6], 0 }
   0x3   :  { %14 = vsyncpa [#allocation4], 0 }
   0x4   :  { %16 = vsyncpa [#allocation4 + $0x1], 0  ;;  %s883_s18 = smov 0   ;;  %s885_s19 = smov 0  }
   0x5   :  { %s887_s20 = smov 0   ;;  %s889_s21 = smov 0  }
   0x6 LB: > { %s904_s22 = sadd.s32 4294967295, %s842_s21   ;;  %s548_s23 = sadd.s32 4294967294, %s842_s21   ;;  %s842_s21 = sphi %s889_s21, %s1150_s21   ;;  %s838_s20 = sphi %s887_s20, %s1149_s20   ;;  %s834_s19 = sphi %s885_s19, %s1148_s19   ;;  %s830_s18 = sphi %s883_s18, %s1147_s18  }
   0x7   : > { %p42_p0 = scmp.ne.s32.totalorder %s834_s19, %s830_s18  ;;  %p1131_p1 = scmp.eq.s32.totalorder %s904_s22, 0 }
   0x8   : > { %p156_p3 = scmp.eq.s32.totalorder %s548_s23, 1  ;;  %p549_p5 = scmp.ge.s32.totalorder %s842_s21, 1 }
   0x9   : > { %p913_p4 = por %p1131_p1, %p42_p0  ;;  %p163_p7 = scmp.lt.s32.totalorder %s842_s21, 3 }
   0xa   : > { %p918_p6 = por %p156_p3, %p42_p0  ;;  %s844_s27 = smov [#allocation5]  }
   0xb   : > { %s1134_s24 = scalar_select %p913_p4, 1, 0 }
   0xc   : > { %s1135_s25 = scalar_select %p918_p6, 1, 0 }
   0xd   : > { %p923_p8 = pnand %p549_p5, %p163_p7  ;;  %s175_s28 = sshll.u32 %s844_s27, 4  ;;  %s927_s28 = int_to_ptr.vmem [resolvable:$true] %s175_s28 }
   0xe   : > { %s845_s30 = smov [#allocation7]   ;;  %s686_s9 = scalar_lea.hbm %s1126_s1, 512 }
   0xf   : > { %p624_p9 = pneg %p923_p8  ;;  %s191_s6 = sshll.u32 %s845_s30, 4  ;;  %s938_s6 = int_to_ptr.vmem [resolvable:$true] %s191_s6 }
  0x10   : > { %p687_p12 = scmp.ne.s32.totalorder %s1126_s1, %s686_s9  ;;  %p693_p5 = scmp.lt.u32.totalorder %s686_s9, %s1126_s1 }
  0x11   : > { %p934_p11 = pnand %p624_p9, %p1131_p1 }
  0x13   : > { %p688_p13 = pneg %p934_p11 }
  0x15   : > { %p689_p0 = pnand %p688_p13, %p687_p12 }
  0x17   : > { %p690_p3 = pneg %p689_p0 }
  0x19   : > { %p695_p7 = pnand %p693_p5, %p690_p3 }
  0x1b   : > { %698 = shalt.err (!%p695_p7)
}
  0x1c   : > { %s699_s14 = scalar_lea.vmem %s927_s28, 512  ;;  %p707_p2 = scmp.lt.s32.totalorder %s927_s28, %s927_s28 }
  0x1d   : > { %p700_p9 = scmp.ne.s32.totalorder %s927_s28, %s699_s14  ;;  %p708_p12 = scmp.lt.s32.totalorder %s699_s14, %s699_s14 }
  0x1f   : > { %p702_p10 = pnand %p700_p9, %p688_p13  ;;  %p709_p0 = por %p708_p12, %p707_p2 }
  0x21   : > { %p703_p1 = pneg %p702_p10 }
  0x23   : > { %p710_p6 = pnand %p709_p0, %p703_p1 }
  0x25   : > { %713 = shalt.err (!%p710_p6)
}
  0x26   : > { %s846_s15 = smov 128   ;;  %s847_s16 = smov 8  }
  0x27   : > { %627 = dma.hbm_to_vmem [thread:$0]  (!%p934_p11), %s1126_s1, 512, %s927_s28, [#allocation6], %s846_s15, %s846_s15, %s847_s16  }
  0x28   : > { %s714_s7 = scalar_lea.hbm %s1128_s3, 512 }
  0x29   : > { %p715_p2 = scmp.ne.s32.totalorder %s1128_s3, %s714_s7  ;;  %p721_p10 = scmp.lt.u32.totalorder %s714_s7, %s1128_s3 }
  0x2b   : > { %p717_p1 = pnand %p715_p2, %p688_p13 }
  0x2d   : > { %p718_p6 = pneg %p717_p1 }
  0x2f   : > { %p723_p3 = pnand %p721_p10, %p718_p6 }
  0x31   : > { %726 = shalt.err (!%p723_p3)
}
  0x32   : > { %s727_s28 = scalar_lea.vmem %s938_s6, 512  ;;  %p735_p12 = scmp.lt.s32.totalorder %s938_s6, %s938_s6 }
  0x33   : > { %p728_p5 = scmp.ne.s32.totalorder %s938_s6, %s727_s28  ;;  %p736_p0 = scmp.lt.s32.totalorder %s727_s28, %s727_s28 }
  0x35   : > { %p730_p7 = pnand %p728_p5, %p688_p13  ;;  %p737_p2 = por %p736_p0, %p735_p12 }
  0x37   : > { %p731_p9 = pneg %p730_p7 }
  0x39   : > { %p738_p1 = pnand %p737_p2, %p731_p9 }
  0x3b   : > { %741 = shalt.err (!%p738_p1)
}
  0x3c   : > { %630 = dma.hbm_to_vmem [thread:$0]  (!%p934_p11), %s1128_s3, 512, %s938_s6, [#allocation6], %s846_s15, %s846_s15, %s847_s16  }
  0x3d   : > { %s993_s14 = sadd.s32 1, %s842_s21   ;;  %s29_s29 = sadd.s32 1, %s838_s20 }
  0x3e   : > { %s26_s17 = ssub.s32 %s842_s21, %s993_s14  ;;  %p36_p13 = scmp.ne.s32.totalorder %s838_s20, %s834_s19 }
  0x3f   : > { %p27_p6 = scmp.eq.s32.totalorder %s26_s17, 0  ;;  %p37_p10 = scmp.eq.s32.totalorder %s842_s21, 0 }
  0x40   : > { %p1138_p3 = scmp.eq.s32.totalorder %s904_s22, 1  ;;  %p641_p7 = scmp.lt.s32.totalorder %s842_s21, 2 }
  0x41   : > { %s1009_s27 = scalar_select %p27_p6, %s838_s20, %s29_s29  }
  0x42   : > { %p1003_p5 = por %p1138_p3, %p36_p13  ;;  %p38_p9 = por %p37_p10, %p36_p13 }
  0x43   : > { %s208_s30 = sand.u32 1, %s838_s20   ;;  %s554_s6 = sshll.u32 %s842_s21, 7 }
  0x44   : > { %s1139_s23 = scalar_select %p1003_p5, 1, 0 }
  0x45   : > { %s553_s7 = sshll.u32 %s208_s30, 3  ;;  %s1016_s8 = scalar_lea.hbm %s1125_s0, %s554_s6 }
  0x46   : > { %s212_s9 = scalar_lea.vmem [#allocation2], %s553_s7  ;;  %p1020_p11 = pnand %p641_p7, %p38_p9 }
  0x47   : > { %s219_s10 = sshll.u32 %s212_s9, 4  ;;  %s209_s28 = scalar_lea.sflag [#allocation3], %s208_s30  ;;  %s1018_s10 = int_to_ptr.vmem [resolvable:$true] %s219_s10 }
  0x48   : > { %s742_s12 = scalar_lea.hbm %s1016_s8, 128  ;;  %p744_p0 = pneg %p1020_p11 }
  0x49   : > { %p743_p12 = scmp.ne.s32.totalorder %s1016_s8, %s742_s12  ;;  %s747_s17 = scalar_lea.hbm %s1125_s0, 256 }
  0x4a   : > { %p748_p13 = scmp.lt.u32.totalorder %s1016_s8, %s1125_s0  ;;  %p749_p6 = scmp.lt.u32.totalorder %s747_s17, %s742_s12 }
  0x4b   : > { %p745_p2 = pnand %p744_p0, %p743_p12  ;;  %p751_p3 = scmp.lt.u32.totalorder %s742_s12, %s1016_s8 }
  0x4c   : > { %p750_p10 = por %p749_p6, %p748_p13 }
  0x4d   : > { %p746_p1 = pneg %p745_p2 }
  0x4e   : > { %p752_p7 = por %p751_p3, %p750_p10 }
  0x50   : > { %p753_p9 = pnand %p752_p7, %p746_p1 }
  0x52   : > { %756 = shalt.err (!%p753_p9)
}
  0x53   : > { %s757_s30 = scalar_lea.vmem %s1018_s10, 128  ;;  %s848_s15 = smov [#allocation2]  }
  0x54   : > { %p758_p12 = scmp.ne.s32.totalorder %s1018_s10, %s757_s30  ;;  %s762_s16 = sshll.u32 %s848_s15, 4  ;;  %s763_s16 = int_to_ptr.vmem [resolvable:$false] %s762_s16 }
  0x55   : > { %s764_s9 = scalar_lea.vmem %s763_s16, 256  ;;  %p765_p4 = scmp.lt.s32.totalorder %s1018_s10, %s763_s16 }
  0x56   : > { %p760_p2 = pnand %p758_p12, %p744_p0  ;;  %p766_p13 = scmp.lt.s32.totalorder %s764_s9, %s757_s30 }
  0x58   : > { %p761_p5 = pneg %p760_p2  ;;  %p767_p6 = por %p766_p13, %p765_p4 }
  0x5a   : > { %p768_p10 = pnand %p767_p6, %p761_p5 }
  0x5c   : > { %771 = shalt.err (!%p768_p10)
}
  0x5d   : > { %634 = dma.hbm_to_vmem [thread:$0]  (!%p1020_p11), %s1016_s8, 128, %s1018_s10, %s209_s28  }
  0x5e   : > { %228 = sbr.rel (%p923_p8) target bundleno = 574 (0x23e), region = 40  ;;  %s1052_s12 = sand.u32 (!%p923_p8), 1, %s834_s19  }
  0x5f   : > { %s556_s13 = sshll.u32 (!%p923_p8), %s1052_s12, 3  ;;  %s231_s29 = scalar_lea.sflag (!%p923_p8), [#allocation3], %s1052_s12 }
  0x60   : > { %s234_s17 = scalar_lea.vmem (!%p923_p8), [#allocation2], %s556_s13  ;;  %p1141_p4 = scmp.ne.s32.totalorder (!%p923_p8), %s1134_s24, 0 }
  0x65   : > { %817 = dma.done.wait (%p1141_p4), %s231_s29, 128  }
  0x66   : > { %819 = vsyncadd (%p1141_p4), %s231_s29, 4294967168  ;;  %p1142_p5 = scmp.eq.s32.totalorder %s904_s22, 0 }
  0x68   : > { %821 = dma.done.wait (%p1142_p5), [#allocation6], 1024   ;;  %p1143_p8 = pmov %p1142_p5 }
  0x69   : > { %v849_v0 = vmov 0.0|0.0   ;;  %vm850_vm0 = vmmov 0   ;;  %v851_v1 = vmov 0.0   ;;  %v270_v2 = vld [vmem:[#allocation5] sm:$0xff]  ;;  %v271_v3 = vld [vmem:[#allocation5 + $0x8] sm:$0xff]  ;;  %v272_v4 = vld [vmem:[#allocation5 + $0x10] sm:$0xff] }
  0x6a   : > { %823 = vsyncadd (%p1143_p8), [#allocation6], 4294966272  ;;  %600 = vmatprep.subr.bf16.mxu0 %v849_v0  ;;  %586 = vmatprep.mubr.msk.f32.mxu0 %vm850_vm0, %v851_v1  ;;  %v601_v5 = vpack.c.bf16 %v271_v3, %v270_v2  ;;  %v273_v6 = vld [vmem:[#allocation5 + $0x18] sm:$0xff]  ;;  %vm281_vm1 = vcmask 261120   ;;  %v360_v9 = vld [vmem:[#allocation7] sm:$0xff]  ;;  %s565_s11 = sshll.u32 %s904_s22, 7 }
  0x6b   : > { %606 = vmatprep.subr.bf16.mxu1 %v849_v0  ;;  %597 = vmatprep.mubr.msk.f32.mxu1 %vm850_vm0, %v851_v1  ;;  %v604_v7 = vpack.c.bf16 %v273_v6, %v272_v4  ;;  %v269_v8 = vld [vmem:[%s234_s17] sm:$0xff]  ;;  %v361_v10 = vld [vmem:[#allocation7 + $0x8] sm:$0xff]  ;;  %s268_s28 = scalar_lea.vmem [#allocation8], %s556_s13  ;;  %s1080_s15 = scalar_lea.hbm %s1130_s5, %s565_s11 }
  0x6c   : > { %602 = vmatpush3.bf16.msra.mxu0 %v601_v5  ;;  %v607_v11 = vpack.c.bf16 %v361_v10, %v360_v9  ;;  %v362_v12 = vld [vmem:[#allocation7 + $0x10] sm:$0xff]  ;;  %v363_v13 = vld [vmem:[#allocation7 + $0x18] sm:$0xff]  ;;  %s459_s7 = sshll.u32 %s268_s28, 4  ;;  %s446_s16 = scalar_lea.sflag [#allocation4], %s1052_s12  ;;  %s1082_s7 = int_to_ptr.vmem [resolvable:$true] %s459_s7 }
  0x6d   : > { %603 = vmatprep.subr.bf16.mxu0 %v849_v0  ;;  %v610_v14 = vpack.c.bf16 %v363_v13, %v362_v12  ;;  %v560_v15 = vld [vmem:[%s1127_s2] ss:$0 sm:$0xff]  ;;  %s772_s22 = scalar_lea.vmem %s1082_s7, 128  ;;  %p1144_p0 = scmp.ne.s32.totalorder %s1139_s23, 0 }
  0x6e   : > { %608 = vmatpush3.bf16.msra.mxu1 %v607_v11  ;;  %v562_v24 = vld [vmem:[%s1129_s4] ss:$0 sm:$0xff]  ;;  %p773_p11 = scmp.ne.s32.totalorder %s1082_s7, %s772_s22  ;;  %s852_s9 = smov [#allocation8]  }
  0x6f   : > { %609 = vmatprep.subr.bf16.mxu1 %v849_v0  ;;  %s776_s13 = sshll.u32 %s852_s9, 4  ;;  %s777_s13 = int_to_ptr.vmem [resolvable:$false] %s776_s13 }
  0x70   : > { %605 = vmatpush3.bf16.msra.mxu0 %v604_v7  ;;  %p774_p1 = pnand %p773_p11, %p1144_p0  ;;  %s778_s29 = scalar_lea.vmem %s777_s13, 256 }
  0x71   : > { %p779_p7 = scmp.lt.s32.totalorder %s1082_s7, %s777_s13  ;;  %p780_p9 = scmp.lt.s32.totalorder %s778_s29, %s772_s22 }
  0x72   : > { %611 = vmatpush3.bf16.msra.mxu1 %v610_v14  ;;  %p775_p3 = pneg %p774_p1 }
  0x73   : > { %587 = vmatmul.mubr.msk.f32.vlgmr.msra.gmra.mrb[0].mxu0 %vm281_vm1, %v269_v8  ;;  %p781_p12 = por %p780_p9, %p779_p7 }
  0x75   : > { %p782_p2 = pnand %p781_p12, %p775_p3 }
 0x146   : > { %v351_v16 = vpop.f32.mrb[0].mxu0 }
 0x147   : > { %v352_v17 = vadd.f32 %v560_v15, %v351_v16  ;;  %v588_v18 = vpop.f32.mrb[1].mxu0 }
 0x149   : > { %v356_v19 = vmul.f32 0.70710677, %v352_v17  ;;  %v355_v21 = vmul.f32 0.5, %v352_v17 }
 0x14b   : > { %684 = verf.f32 %v356_v19 }
 0x155   : > { %v685_v20 = vpop.eup %684 }
 0x156   : > { %v358_v22 = vadd.f32 1.0, %v685_v20 }
 0x158   : > { %v359_v23 = vmul.f32 %v358_v22, %v355_v21 }
 0x15a   : > { %598 = vmatmul.mubr.msk.f32.vlgmr.msra.gmra.mrb[0].mxu1 %vm281_vm1, %v359_v23 }
 0x22d   : > { %v440_v25 = vpop.f32.mrb[0].mxu1 }
 0x22e   : > { %v441_v26 = vadd.f32 %v562_v24, %v440_v25  ;;  %v599_v27 = vpop.f32.mrb[1].mxu1 }
 0x230   : > { %444 = vst.msk [vmem:[%s268_s28] sm:$0xff] %vm281_vm1, %v441_v26 }
 0x231   : > { %785 = shalt.err (!%p782_p2)
}
 0x232   : > { %s786_s12 = scalar_lea.hbm %s1080_s15, 128  ;;  %s790_s26 = scalar_lea.hbm %s1130_s5, 256 }
 0x233   : > { %p787_p13 = scmp.ne.s32.totalorder %s1080_s15, %s786_s12  ;;  %p791_p4 = scmp.lt.u32.totalorder %s1080_s15, %s1130_s5 }
 0x234   : > { %p792_p5 = scmp.lt.u32.totalorder %s790_s26, %s786_s12  ;;  %p794_p11 = scmp.lt.u32.totalorder %s786_s12, %s1080_s15 }
 0x235   : > { %p788_p6 = pnand %p787_p13, %p1144_p0 }
 0x236   : > { %p793_p8 = por %p792_p5, %p791_p4 }
 0x237   : > { %p789_p10 = pneg %p788_p6 }
 0x238   : > { %p795_p1 = por %p794_p11, %p793_p8 }
 0x23a   : > { %p796_p3 = pnand %p795_p1, %p789_p10 }
 0x23c   : > { %799 = shalt.err (!%p796_p3)
}
 0x23d   : > { %622 = dma.vmem_to_hbm [thread:$0]  (%p1144_p0), %s1082_s7, 128, %s1080_s15, %s446_s16  }
 0x23e PF: > { %s471_s11 = sand.u32 1, %s830_s18   ;;  %p1145_p7 = scmp.ne.s32.totalorder %s1135_s25, 0 }
 0x23f   : > { %p1146_p9 = scmp.ge.s32.totalorder %s842_s21, 2  ;;  %s472_s28 = scalar_lea.sflag [#allocation4], %s471_s11 }
 0x241   : > { %p636_p12 = pnand %p1146_p9, %p1145_p7 }
 0x243   : > { %825 = dma.done.wait (!%p636_p12), %s472_s28, 128  }
 0x244   : > { %827 = vsyncadd (!%p636_p12), %s472_s28, 4294967168  ;;  %p19_p2 = scmp.ge.s32.totalorder %s993_s14, 4   ;;  %s1147_s18 = smov %s834_s19 }
 0x245   : > { %s1148_s19 = smov %s838_s20  ;;  %s1149_s20 = smov %s1009_s27 }
 0x246   : > { %s1150_s21 = smov %s993_s14  ;;  %21 = sbr.rel (!%p19_p2) target bundleno = 6 (0x6), region = 93 }
 0x24d   :  { %477 = vsyncpa [#allocation3], 1 }
 0x24e   :  { %479 = vsyncpa [#allocation3 + $0x1], 1 }
 0x24f   :  { %480 = vsyncpa [#allocation6], 1 }
 0x250   :  { %481 = vsyncpa [#allocation4], 1 }
 0x251   :  { %483 = vsyncpa [#allocation4 + $0x1], 1 }

</bundles_post_ra>
